<compile_context>
chip_gen: v5e
topology: v5e:2x2
jax: 0.10.0
libtpu: 0.0.40
codegen_flags: <defaults>
</compile_context>

<pallas_src>
import jax
import jax.numpy as jnp
from jax.experimental import pallas as pl
from jax.experimental.pallas import tpu as pltpu


def pearl_kernel(h_ref, mask_ref, inv_ref, wt_ref, b_ref,
                 phrase_ref, type_ref, sum_acc):
    # h_ref:      (tb, ts, D)   encoder activations tile, native dtype (bf16/f32)
    # mask_ref:   (tb, 1, ts)   binarized 0/1 mask tile, same dtype as h
    # inv_ref:    (tb, 1)  f32  1 / max(attention_mask.sum(dim=1), 1)
    # wt_ref:     (D, Lp)  f32  type_fc.weight^T zero-padded to Lp lanes
    # b_ref:      (1, Lp)  f32  type_fc.bias zero-padded to Lp lanes
    # phrase_ref: (tb, D)       masked-mean output
    # type_ref:   (tb, Lp)      padded logits output
    # sum_acc:    (tb, 1, D) f32 running masked sum (VMEM scratch)
    s = pl.program_id(1)

    @pl.when(s == 0)
    def _init():
        sum_acc[...] = jnp.zeros_like(sum_acc)

    # Masked sum over this sequence tile on the MXU:
    # (tb,1,ts) x (tb,ts,D) -> (tb,1,D), native-dtype inputs, f32 accumulation.
    sum_acc[...] += jnp.einsum(
        "bqs,bsd->bqd", mask_ref[...], h_ref[...],
        preferred_element_type=jnp.float32)

    @pl.when(s == pl.num_programs(1) - 1)
    def _finalize():
        # squeeze the unit q-dim (trivial reduce), scale by precomputed 1/denom
        phrase = jnp.sum(sum_acc[...], axis=1) * inv_ref[...]          # (tb, D)
        phrase_ref[...] = phrase.astype(phrase_ref.dtype)
        type_ref[...] = (
            jnp.dot(phrase, wt_ref[...], preferred_element_type=jnp.float32)
            + b_ref[...]
        ).astype(type_ref.dtype)


def _default_vmem_limit_bytes():
    """Scoped-VMEM limit per detected chip (v5e/v6e: 128 MiB physical, v7x: 64 MiB)."""
    try:
        kind = jax.devices()[0].device_kind.lower()
    except Exception:
        kind = ""
    if "v7" in kind or "7x" in kind:
        return 48 * 1024 * 1024
    if "v5" in kind or "v6" in kind:
        return 100 * 1024 * 1024
    return 64 * 1024 * 1024   # unknown chip: conservative


def _pick_tiles(B, S, D, h_bytes, Lp, budget_bytes):
    """Pick (tb, ts) from an explicit VMEM budget.

    tb: second-to-last dim of the (tb,D)/(tb,Lp) output blocks -> multiple of 8 or == B.
    ts: lane dim of the (tb,1,ts) mask block -> multiple of 128 or == S
        (also satisfies the h block's sublane / bf16-packing constraints).
    """
    tb_cands = [c for c in (128, 64, 32, 16, 8) if B % c == 0]
    if not tb_cands:
        tb_cands = [B]                                   # small / ragged batch fallback
    ts_cands = [c for c in (2048, 1024, 512, 256, 128) if S % c == 0]
    if not ts_cands:
        ts_cands = [S]                                   # ragged sequence fallback

    def vmem_usage(tb, ts):
        h_tile = tb * ts * D * h_bytes                   # streamed activations
        mask_tile = tb * 8 * ts * h_bytes                # (tb,1,ts): sublane 1 pads to 8
        inv_tile = max(tb, 8) * 128 * 4                  # (tb,1): lane 1 pads to 128
        weights = (D * Lp + 8 * Lp) * 4                  # resident head params
        outs = (tb * D + tb * Lp) * 4
        scratch = tb * 8 * D * 4                         # (tb,1,D) f32 accumulator
        return 2 * (h_tile + mask_tile + inv_tile + weights + outs) + scratch

    fitting = [(tb, ts) for tb in tb_cands for ts in ts_cands
               if vmem_usage(tb, ts) <= budget_bytes]
    if not fitting:
        return min(tb_cands), min(ts_cands)              # smallest tiles as last resort
    # prefer >=2 batch grid steps (v7x megacore), then the largest streamed tile,
    # then the longer sequence tile (DMA efficiency).
    return max(fitting, key=lambda p: (B // p[0] >= 2, p[0] * p[1], p[1]))


def pearl_forward(last_hidden_states, attention_mask, fc_weight, fc_bias,
                  *, tb=None, ts=None):
    """last_hidden_states: [B,S,D] (bf16/f32 straight from the encoder),
    attention_mask: [B,S] ints/bool, fc_weight: [L,D] (torch Linear), fc_bias: [L]."""
    B, S, D = last_hidden_states.shape
    L = fc_weight.shape[0]
    h_dtype = last_hidden_states.dtype
    h_bytes = jnp.dtype(h_dtype).itemsize

    Lp = ((L + 127) // 128) * 128                        # lane-dense padded label dim

    vmem_limit = _default_vmem_limit_bytes()
    budget = int(vmem_limit * 0.85)

    if tb is None or ts is None:
        auto_tb, auto_ts = _pick_tiles(B, S, D, h_bytes, Lp, budget)
        tb = auto_tb if tb is None else tb
        ts = auto_ts if ts is None else ts
    assert B % tb == 0 and (tb % 8 == 0 or tb == B), "batch tile must divide B (mult of 8 or ==B)"
    assert S % ts == 0 and (ts % 128 == 0 or ts == S), "seq tile must divide S (mult of 128 or ==S)"

    # --- lane-dense padded head parameters (resident in VMEM, loaded once) ----
    wt = jnp.zeros((D, Lp), jnp.float32).at[:, :L].set(
        jnp.transpose(fc_weight).astype(jnp.float32))
    b2 = jnp.zeros((1, Lp), jnp.float32).at[:, :L].set(
        fc_bias.astype(jnp.float32).reshape(1, L))

    # --- tiny wrapper-side mask precompute (single pass over the (B,S) mask) --
    # numerator: binarized masked_fill semantics, in h's dtype so the MXU gets
    # native-dtype operands; shaped (B,1,S) so its block is lane-dense over S.
    mask_q = (attention_mask != 0).astype(h_dtype).reshape(B, 1, S)
    # denominator: raw mask sum (matches torch attention_mask.sum(dim=1)),
    # guarded so a fully padded row yields 0 instead of NaN/Inf.
    denom = attention_mask.sum(axis=1).astype(jnp.float32)
    inv_denom = (1.0 / jnp.maximum(denom, 1.0)).reshape(B, 1)

    grid = (B // tb, S // ts)

    phrase_vec, type_pad = pl.pallas_call(
        pearl_kernel,
        out_shape=(
            jax.ShapeDtypeStruct((B, D), jnp.float32),
            jax.ShapeDtypeStruct((B, Lp), jnp.float32),
        ),
        grid_spec=pltpu.PrefetchScalarGridSpec(
            num_scalar_prefetch=0,
            grid=grid,
            in_specs=[
                pl.BlockSpec((tb, ts, D), lambda b, s: (b, s, 0)),   # h (streamed)
                pl.BlockSpec((tb, 1, ts), lambda b, s: (b, 0, s)),   # 0/1 mask (lane-dense)
                pl.BlockSpec((tb, 1), lambda b, s: (b, 0)),          # 1/denom (per batch tile)
                pl.BlockSpec((D, Lp), lambda b, s: (0, 0)),          # head weight (resident)
                pl.BlockSpec((1, Lp), lambda b, s: (0, 0)),          # head bias (resident)
            ],
            out_specs=[
                pl.BlockSpec((tb, D), lambda b, s: (b, 0)),          # phrase (written at s==last)
                pl.BlockSpec((tb, Lp), lambda b, s: (b, 0)),         # padded logits
            ],
            scratch_shapes=[
                pltpu.VMEM((tb, 1, D), jnp.float32),                 # masked-sum accumulator
            ],
        ),
        compiler_params=pltpu.CompilerParams(
            dimension_semantics=("parallel", "arbitrary"),           # batch parallel, seq reduce
            vmem_limit_bytes=vmem_limit,
        ),
    )(last_hidden_states, mask_q, inv_denom, wt, b2)

    return phrase_vec, type_pad[:, :L]


def pearl_reference(last_hidden_states, attention_mask, fc_weight, fc_bias):
    h = last_hidden_states.astype(jnp.float32)
    mask_f = (attention_mask != 0).astype(jnp.float32)
    phrase = (h * mask_f[:, :, None]).sum(axis=1) / \
        attention_mask.sum(axis=1)[:, None].astype(jnp.float32)
    type_vec = phrase @ fc_weight.T.astype(jnp.float32) + fc_bias.astype(jnp.float32)
    return phrase, type_vec


if __name__ == "__main__":
    B, S, D, L = 2, 256, 32, 4   # batch, seq, hidden dim, label_num

    key = jax.random.PRNGKey(0)
    k_h, k_w, k_b = jax.random.split(key, 3)

    # synthetic encoder outputs kept in bf16, exactly as an encoder would emit them
    last_hidden_states = jax.random.normal(k_h, (B, S, D), dtype=jnp.float32).astype(jnp.bfloat16)
    # attention mask: first sequence has 64 padded positions, second is fully valid
    lengths = jnp.array([192, 256], dtype=jnp.int32)
    attention_mask = (jnp.arange(S)[None, :] < lengths[:, None]).astype(jnp.int32)

    # deterministic type_fc parameters (Linear(D, L))
    fc_weight = jax.random.normal(k_w, (L, D), dtype=jnp.float32) * 0.05
    fc_bias = jax.random.normal(k_b, (L,), dtype=jnp.float32) * 0.05

    # ts=128 -> two sequence tiles, exercising the pipelined cross-step accumulation
    phrase_vec, type_vec = pearl_forward(
        last_hidden_states, attention_mask, fc_weight, fc_bias, ts=128)
    jax.block_until_ready((phrase_vec, type_vec))

    # sanity check against pure-JAX reference
    ref_phrase, ref_type = pearl_reference(last_hidden_states, attention_mask, fc_weight, fc_bias)
    assert phrase_vec.shape == (B, D) and type_vec.shape == (B, L)
    assert jnp.allclose(phrase_vec, ref_phrase, atol=1e-4, rtol=1e-4)
    assert jnp.allclose(type_vec, ref_type, atol=1e-4, rtol=1e-4)

    print("KERNEL_OK")
</pallas_src>

<mosaic_0001>
module attributes {stable_mosaic.version = 11 : i64} {
  func.func @pearl_kernel(%arg0: i32, %arg1: i32, %arg2: memref<2x128x32xbf16, #tpu.memory_space<vmem>>, %arg3: memref<2x1x128xbf16, #tpu.memory_space<vmem>>, %arg4: memref<2x1xf32, #tpu.memory_space<vmem>>, %arg5: memref<32x128xf32, #tpu.memory_space<vmem>>, %arg6: memref<1x128xf32, #tpu.memory_space<vmem>>, %arg7: memref<2x32xf32, #tpu.memory_space<vmem>>, %arg8: memref<2x128xf32, #tpu.memory_space<vmem>>, %arg9: memref<2x1x32xf32, #tpu.memory_space<vmem>>) attributes {dimension_semantics = [#tpu.dimension_semantics<parallel>, #tpu.dimension_semantics<arbitrary>], iteration_bounds = array<i64: 1, 2>, scalar_prefetch = 0 : i64, scratch_operands = 1 : i64, tpu.core_type = #tpu.core_type<tc>, window_params = [{transform_indices = @transform_0, window_bounds = array<i64: 2, 128, 32>}, {transform_indices = @transform_1, window_bounds = array<i64: 2, 1, 128>}, {transform_indices = @transform_2, window_bounds = array<i64: 2, 1>}, {pipeline_mode = #tpu.pipeline_mode<synchronous>, transform_indices = @transform_3, window_bounds = array<i64: 32, 128>}, {pipeline_mode = #tpu.pipeline_mode<synchronous>, transform_indices = @transform_4, window_bounds = array<i64: 1, 128>}, {transform_indices = @transform_5, window_bounds = array<i64: 2, 32>}, {transform_indices = @transform_6, window_bounds = array<i64: 2, 128>}]} {
    %c0_i32 = arith.constant 0 : i32
    %0 = arith.cmpi eq, %arg1, %c0_i32 : i32
    %1 = arith.extui %0 : i1 to i32
    %c0_i32_0 = arith.constant 0 : i32
    %2 = arith.cmpi ne, %1, %c0_i32_0 : i32
    scf.if %2 {
      %cst_13 = arith.constant 0.000000e+00 : f32
      %12 = vector.broadcast %cst_13 : f32 to vector<2x1x32xf32>
      %c0_14 = arith.constant 0 : index
      %c0_15 = arith.constant 0 : index
      %c0_16 = arith.constant 0 : index
      %13 = vector.load %arg9[%c0_14, %c0_15, %c0_16] : memref<2x1x32xf32, #tpu.memory_space<vmem>>, vector<2x1x32xf32>
      tpu.vector_store %arg9[%c0_14, %c0_15, %c0_16], %12 {strides = array<i32>} : memref<2x1x32xf32, #tpu.memory_space<vmem>>, vector<2x1x32xf32>,
    } else {
    }
    %c0 = arith.constant 0 : index
    %c0_1 = arith.constant 0 : index
    %c0_2 = arith.constant 0 : index
    %3 = vector.load %arg9[%c0, %c0_1, %c0_2] : memref<2x1x32xf32, #tpu.memory_space<vmem>>, vector<2x1x32xf32>
    %c0_3 = arith.constant 0 : index
    %c0_4 = arith.constant 0 : index
    %c0_5 = arith.constant 0 : index
    %4 = vector.load %arg3[%c0_3, %c0_4, %c0_5] : memref<2x1x128xbf16, #tpu.memory_space<vmem>>, vector<2x1x128xbf16>
    %c0_6 = arith.constant 0 : index
    %c0_7 = arith.constant 0 : index
    %c0_8 = arith.constant 0 : index
    %5 = vector.load %arg2[%c0_6, %c0_7, %c0_8] : memref<2x128x32xbf16, #tpu.memory_space<vmem>>, vector<2x128x32xbf16>
    "tpu.trace_start"() <{level = 10 : i32, message = "bqs,bsd->bqd"}> : () -> ()
    %cst = arith.constant dense<0.000000e+00> : vector<2x1x32xf32>
    %6 = tpu.matmul %4, %5, %cst {dimension_numbers = #tpu.dot_dimension_numbers<[2], [1], [1], [2], [0, 0, 0, 1, 1, 2], [0], [0]>} : vector<2x1x128xbf16>, vector<2x128x32xbf16>, vector<2x1x32xf32> -> vector<2x1x32xf32>
    "tpu.trace_stop"() : () -> ()
    %7 = arith.addf %3, %6 : vector<2x1x32xf32>
    %c0_9 = arith.constant 0 : index
    %c0_10 = arith.constant 0 : index
    %c0_11 = arith.constant 0 : index
    %8 = vector.load %arg9[%c0_9, %c0_10, %c0_11] : memref<2x1x32xf32, #tpu.memory_space<vmem>>, vector<2x1x32xf32>
    tpu.vector_store %arg9[%c0_9, %c0_10, %c0_11], %7 {strides = array<i32>} : memref<2x1x32xf32, #tpu.memory_space<vmem>>, vector<2x1x32xf32>,
    %c1_i32 = arith.constant 1 : i32
    %9 = arith.cmpi eq, %arg1, %c1_i32 : i32
    %10 = arith.extui %9 : i1 to i32
    %c0_i32_12 = arith.constant 0 : i32
    %11 = arith.cmpi ne, %10, %c0_i32_12 : i32
    scf.if %11 {
      %c0_13 = arith.constant 0 : index
      %c0_14 = arith.constant 0 : index
      %c0_15 = arith.constant 0 : index
      %12 = vector.load %arg9[%c0_13, %c0_14, %c0_15] : memref<2x1x32xf32, #tpu.memory_space<vmem>>, vector<2x1x32xf32>
      %cst_16 = arith.constant dense<0.000000e+00> : vector<2x32xf32>
      %13 = vector.multi_reduction <add>, %12, %cst_16 [1] : vector<2x1x32xf32> to vector<2x32xf32>
      %c0_17 = arith.constant 0 : index
      %c0_18 = arith.constant 0 : index
      %14 = vector.load %arg4[%c0_17, %c0_18] : memref<2x1xf32, #tpu.memory_space<vmem>>, vector<2x1xf32>
      %15 = vector.broadcast %14 : vector<2x1xf32> to vector<2x32xf32>
      %16 = arith.mulf %13, %15 : vector<2x32xf32>
      %c0_19 = arith.constant 0 : index
      %c0_20 = arith.constant 0 : index
      %17 = vector.load %arg7[%c0_19, %c0_20] : memref<2x32xf32, #tpu.memory_space<vmem>>, vector<2x32xf32>
      tpu.vector_store %arg7[%c0_19, %c0_20], %16 {strides = array<i32>} : memref<2x32xf32, #tpu.memory_space<vmem>>, vector<2x32xf32>,
      %c0_21 = arith.constant 0 : index
      %c0_22 = arith.constant 0 : index
      %18 = vector.load %arg5[%c0_21, %c0_22] : memref<32x128xf32, #tpu.memory_space<vmem>>, vector<32x128xf32>
      %cst_23 = arith.constant dense<0.000000e+00> : vector<2x128xf32>
      %19 = tpu.matmul %16, %18, %cst_23 {dimension_numbers = #tpu.dot_dimension_numbers<[1], [0], [0], [1], [0, 0, 1, 1], [], []>} : vector<2x32xf32>, vector<32x128xf32>, vector<2x128xf32> -> vector<2x128xf32>
      %c0_24 = arith.constant 0 : index
      %c0_25 = arith.constant 0 : index
      %20 = vector.load %arg6[%c0_24, %c0_25] : memref<1x128xf32, #tpu.memory_space<vmem>>, vector<1x128xf32>
      %21 = vector.broadcast %20 : vector<1x128xf32> to vector<2x128xf32>
      %22 = arith.addf %19, %21 : vector<2x128xf32>
      %c0_26 = arith.constant 0 : index
      %c0_27 = arith.constant 0 : index
      %23 = vector.load %arg8[%c0_26, %c0_27] : memref<2x128xf32, #tpu.memory_space<vmem>>, vector<2x128xf32>
      tpu.vector_store %arg8[%c0_26, %c0_27], %22 {strides = array<i32>} : memref<2x128xf32, #tpu.memory_space<vmem>>, vector<2x128xf32>,
    } else {
    }
    return
  }
  func.func @transform_0(%arg0: i32, %arg1: i32) -> (i32, i32, i32) {
    %c0_i32 = arith.constant 0 : i32
    %c0_i32_0 = arith.constant 0 : i32
    return %arg0, %arg1, %c0_i32 : i32, i32, i32
  }
  func.func @transform_1(%arg0: i32, %arg1: i32) -> (i32, i32, i32) {
    %c0_i32 = arith.constant 0 : i32
    %c0_i32_0 = arith.constant 0 : i32
    return %arg0, %c0_i32, %arg1 : i32, i32, i32
  }
  func.func @transform_2(%arg0: i32, %arg1: i32) -> (i32, i32) {
    %c0_i32 = arith.constant 0 : i32
    %c0_i32_0 = arith.constant 0 : i32
    return %arg0, %c0_i32 : i32, i32
  }
  func.func @transform_3(%arg0: i32, %arg1: i32) -> (i32, i32) {
    %c0_i32 = arith.constant 0 : i32
    %c0_i32_0 = arith.constant 0 : i32
    %c0_i32_1 = arith.constant 0 : i32
    return %c0_i32, %c0_i32_0 : i32, i32
  }
  func.func @transform_4(%arg0: i32, %arg1: i32) -> (i32, i32) {
    %c0_i32 = arith.constant 0 : i32
    %c0_i32_0 = arith.constant 0 : i32
    %c0_i32_1 = arith.constant 0 : i32
    return %c0_i32, %c0_i32_0 : i32, i32
  }
  func.func @transform_5(%arg0: i32, %arg1: i32) -> (i32, i32) {
    %c0_i32 = arith.constant 0 : i32
    %c0_i32_0 = arith.constant 0 : i32
    return %arg0, %c0_i32 : i32, i32
  }
  func.func @transform_6(%arg0: i32, %arg1: i32) -> (i32, i32) {
    %c0_i32 = arith.constant 0 : i32
    %c0_i32_0 = arith.constant 0 : i32
    return %arg0, %c0_i32 : i32, i32
  }
}

</mosaic_0001>

<bundles_post_ra>
// kernel: tpu_custom_call.1
= control target key start
LH: loop header
LB: loop body
LE: loop exit
PB: predicated region body
PF: predicated region fallthrough
CT: control target
= control target key end

     0   :  { %12 = vsyncpa [#allocation6], 0  ;;  %s1345_s0 = inlined_call_operand.vmem [shape: bf16[2,256,32], index: 0, kind: input, shape index: {}]   ;;  %s1346_s1 = inlined_call_operand.vmem [shape: bf16[2,1,256], index: 1, kind: input, shape index: {}]   ;;  %s1347_s2 = inlined_call_operand.vmem [shape: f32[2,1], index: 2, kind: input, shape index: {}]   ;;  %s1348_s3 = inlined_call_operand.vmem [shape: f32[32,128], index: 3, kind: input, shape index: {}]   ;;  %s1349_s4 = inlined_call_operand.vmem [shape: f32[1,128], index: 4, kind: input, shape index: {}]   ;;  %s1350_s5 = inlined_call_operand.hbm [shape: f32[2,32], index: 5, kind: output, shape index: {0}]   ;;  %s1351_s6 = inlined_call_operand.hbm [shape: f32[2,128], index: 6, kind: output, shape index: {1}]  }
   0x1   :  { %13 = vsyncpa [#allocation8], 0  ;;  %s1183_s21 = smov 0   ;;  %s1185_s22 = smov 0  }
   0x2   :  { %s1187_s23 = smov 0   ;;  %s1189_s24 = smov 0  }
   0x3   :  { %s1191_s25 = smov 0  }
   0x4 LB: > { %s881_s26 = sadd.s32 4294967295, %s1142_s25   ;;  %s28_s27 = sadd.s32 1, %s1138_s24  ;;  %s1142_s25 = sphi %s1191_s25, %s19_s25   ;;  %s1138_s24 = sphi %s1189_s24, %s1357_s24   ;;  %s1134_s23 = sphi %s1187_s23, %s1356_s23   ;;  %s1130_s22 = sphi %s1185_s22, %s1355_s22   ;;  %s1126_s21 = sphi %s1183_s21, %s1354_s21  }
   0x5   : > { %p29_p0 = scmp.ge.s32.totalorder %s28_s27, 2  ;;  %p47_p1 = scmp.ne.s32.totalorder %s1130_s22, %s1126_s21 }
   0x6   : > { %p48_p2 = scmp.eq.s32.totalorder %s1142_s25, 0  ;;  %s40_s30 = sadd.s32 1, %s1130_s22 }
   0x7   : > { %s1359_s27 = smov (%p29_p0, %s28_s27), 0  ;;  %p884_p5 = scmp.ge.s32.totalorder %s1142_s25, 2 }
   0x8   : > { %p1215_p3 = por %p48_p2, %p47_p1  ;;  %s36_s29 = ssub.s32 %s1138_s24, %s1359_s27 }
   0x9   : > { %p38_p4 = scmp.eq.s32.totalorder %s36_s29, 0  ;;  %234 = sbr.rel (%p884_p5) target bundleno = 39 (0x27), region = 28 }
   0xb   : > { %s1223_s7 = scalar_select %p38_p4, %s1130_s22, %s40_s30  }
   0xe   : > { %237 = sbr.rel (!%p1215_p3) target bundleno = 34 (0x22), region = 32  ;;  %s239_s8 = sand.u32 (%p1215_p3), 1, %s1130_s22  }
   0xf   : > { %s965_s9 = sshll.u32 (%p1215_p3), %s1138_s24, 6  ;;  %s885_s10 = sshll.u32 (%p1215_p3), %s239_s8, 7 }
  0x10   : > { %s1233_s13 = scalar_lea.vmem (%p1215_p3), %s1345_s0, %s965_s9  ;;  %s241_s14 = scalar_lea.vmem (%p1215_p3), [#allocation3], %s885_s10 }
  0x11   : > { %v264_v0 = vld [vmem:[%s1233_s13] sm:$0xff] (%p1215_p3)   ;;  %v268_v1 = vld [vmem:[%s1233_s13 + $0x8] sm:$0xff] (%p1215_p3)   ;;  %v272_v2 = vld [vmem:[%s1233_s13 + $0x10] sm:$0xff] (%p1215_p3)  }
  0x12   : > { %265 = vst [vmem:[%s241_s14] sm:$0xff] (%p1215_p3), %v264_v0   ;;  %v276_v3 = vld [vmem:[%s1233_s13 + $0x18] sm:$0xff] (%p1215_p3)   ;;  %v280_v4 = vld [vmem:[%s1233_s13 + $0x20] sm:$0xff] (%p1215_p3)   ;;  %v284_v5 = vld [vmem:[%s1233_s13 + $0x28] sm:$0xff] (%p1215_p3)  }
  0x13   : > { %269 = vst [vmem:[%s241_s14 + $0x8] sm:$0xff] %v268_v1   ;;  %v288_v6 = vld [vmem:[%s1233_s13 + $0x30] sm:$0xff]   ;;  %v292_v7 = vld [vmem:[%s1233_s13 + $0x38] sm:$0xff]   ;;  %v296_v8 = vld [vmem:[%s1233_s13 + $0x80] sm:$0xff]  }
  0x14   : > { %273 = vst [vmem:[%s241_s14 + $0x10] sm:$0xff] %v272_v2   ;;  %v300_v9 = vld [vmem:[%s1233_s13 + $0x88] sm:$0xff]   ;;  %v304_v10 = vld [vmem:[%s1233_s13 + $0x90] sm:$0xff]   ;;  %v308_v11 = vld [vmem:[%s1233_s13 + $0x98] sm:$0xff]  }
  0x15   : > { %277 = vst [vmem:[%s241_s14 + $0x18] sm:$0xff] %v276_v3   ;;  %v312_v12 = vld [vmem:[%s1233_s13 + $0xa0] sm:$0xff]   ;;  %v316_v13 = vld [vmem:[%s1233_s13 + $0xa8] sm:$0xff]   ;;  %v320_v14 = vld [vmem:[%s1233_s13 + $0xb0] sm:$0xff]  }
  0x16   : > { %281 = vst [vmem:[%s241_s14 + $0x20] sm:$0xff] %v280_v4   ;;  %v324_v15 = vld [vmem:[%s1233_s13 + $0xb8] sm:$0xff]  }
  0x17   : > { %285 = vst [vmem:[%s241_s14 + $0x28] sm:$0xff] %v284_v5  }
  0x18   : > { %289 = vst [vmem:[%s241_s14 + $0x30] sm:$0xff] %v288_v6  }
  0x19   : > { %293 = vst [vmem:[%s241_s14 + $0x38] sm:$0xff] %v292_v7  }
  0x1a   : > { %297 = vst [vmem:[%s241_s14 + $0x40] sm:$0xff] %v296_v8  }
  0x1b   : > { %301 = vst [vmem:[%s241_s14 + $0x48] sm:$0xff] %v300_v9  }
  0x1c   : > { %305 = vst [vmem:[%s241_s14 + $0x50] sm:$0xff] %v304_v10  }
  0x1d   : > { %309 = vst [vmem:[%s241_s14 + $0x58] sm:$0xff] %v308_v11  }
  0x1e   : > { %313 = vst [vmem:[%s241_s14 + $0x60] sm:$0xff] %v312_v12  }
  0x1f   : > { %317 = vst [vmem:[%s241_s14 + $0x68] sm:$0xff] %v316_v13  }
  0x20   : > { %321 = vst [vmem:[%s241_s14 + $0x70] sm:$0xff] %v320_v14  }
  0x21   : > { %325 = vst [vmem:[%s241_s14 + $0x78] sm:$0xff] %v324_v15  }
  0x22 PF: > { %415 = sbr.rel (!%p1215_p3) target bundleno = 39 (0x27), region = 73  ;;  %s417_s15 = sand.u32 (%p1215_p3), 1, %s1130_s22  }
  0x23   : > { %s423_s18 = scalar_lea.vmem (%p1215_p3), %s1346_s1, %s1138_s24  ;;  %s888_s19 = sshll.u32 (%p1215_p3), %s417_s15, 1 }
  0x24   : > { %v440_v16 = vld [vmem:[%s423_s18] sm:$0x1] (%p1215_p3)  ;;  %v442_v17 = vld [vmem:[%s423_s18 + $0x2] sm:$0x1] (%p1215_p3)  ;;  %s419_s20 = scalar_lea.vmem (%p1215_p3), [#allocation4], %s888_s19 }
  0x25   : > { %441 = vst [vmem:[%s419_s20] sm:$0x1] (%p1215_p3), %v440_v16 }
  0x26   : > { %443 = vst [vmem:[%s419_s20 + $0x1] sm:$0x1] (%p1215_p3), %v442_v17 }
  0x27 PF: > { %p889_p6 = scmp.ge.s32.totalorder %s1142_s25, 1  ;;  %p462_p7 = scmp.lt.s32.totalorder %s1142_s25, 3 }
  0x29   : > { %p463_p8 = pnand %p889_p6, %p462_p7 }
  0x2a   : > { %s469_s28 = sand.u32 (!%p463_p8), 1, %s1126_s21   ;;  %p892_p9 = scmp.ne.s32.totalorder (!%p463_p8), %s1134_s23, 0 }
  0x2b   : > { %466 = sbr.rel (%p463_p8) target bundleno = 502 (0x1f6), region = 107  ;;  %s890_s29 = sshll.u32 (!%p463_p8), %s469_s28, 7 }
  0x2c   : > { %s1261_s30 = sshll.u32 (!%p463_p8), %s469_s28, 1  ;;  %s1263_s8 = scalar_lea.vmem (!%p463_p8), [#allocation3], %s890_s29 }
  0x2d   : > { %s478_s9 = scalar_lea.vmem (!%p463_p8), [#allocation4], %s1261_s30 }
  0x30   : > { %518 = sbr.rel (%p892_p9) target bundleno = 56 (0x38), region = 119 }
  0x35   : > { %vm519_vm0 = vcmask 253952   ;;  %v1144_v18 = vmov 0.0  }
  0x36   : > { %520 = vst.msk [vmem:[#allocation2] sm:$0x1] %vm519_vm0, %v1144_v18 }
  0x37   : > { %521 = vst.msk [vmem:[#allocation2 + $0x1] sm:$0x1] %vm519_vm0, %v1144_v18 }
  0x38 PF: > { %v973_v19 = vld [vmem:[%s1263_s8 + $0x38] sm:$0xff]  ;;  %v972_v21 = vld [vmem:[%s1263_s8 + $0x30] sm:$0xff]  ;;  %v971_v23 = vld [vmem:[%s1263_s8 + $0x28] sm:$0xff]  ;;  %vm682_vm1 = vcmask 253952   ;;  %p957_p10 = scmp.ne.s32.totalorder %s1134_s23, 1 }
  0x39   : > { %v981_v20 = vld [vmem:[%s1263_s8 + $0x78] sm:$0xff]  ;;  %606 = vmatpush.bf16.msra.mxu0 %v973_v19  ;;  %v980_v22 = vld [vmem:[%s1263_s8 + $0x70] sm:$0xff]  ;;  %v979_v24 = vld [vmem:[%s1263_s8 + $0x68] sm:$0xff] }
  0x3a   : > { %667 = vmatpush.bf16.msra.mxu1 %v981_v20  ;;  %v970_v25 = vld [vmem:[%s1263_s8 + $0x20] sm:$0xff]  ;;  %v969_v27 = vld [vmem:[%s1263_s8 + $0x18] sm:$0xff]  ;;  %v968_v29 = vld [vmem:[%s1263_s8 + $0x10] sm:$0xff] }
  0x3b   : > { %v978_v26 = vld [vmem:[%s1263_s8 + $0x60] sm:$0xff]  ;;  %v977_v28 = vld [vmem:[%s1263_s8 + $0x58] sm:$0xff]  ;;  %v976_v30 = vld [vmem:[%s1263_s8 + $0x50] sm:$0xff] }
  0x3c   : > { %v967_v31 = vld [vmem:[%s1263_s8 + $0x8] sm:$0xff]  ;;  %v966_v33 = vld [vmem:[%s1263_s8] sm:$0xff] }
  0x3d   : > { %607 = vmatpush.bf16.msra.mxu0 %v972_v21  ;;  %v975_v32 = vld [vmem:[%s1263_s8 + $0x48] sm:$0xff]  ;;  %v974_v34 = vld [vmem:[%s1263_s8 + $0x40] sm:$0xff]  ;;  %v522_v37 = vld [vmem:[#allocation2] sm:$0x1] }
  0x3e   : > { %668 = vmatpush.bf16.msra.mxu1 %v980_v22  ;;  %v524_v35 = vld [vmem:[%s478_s9] sm:$0x1]  ;;  %v525_v36 = vld [vmem:[%s478_s9 + $0x1] sm:$0x1]  ;;  %v523_v38 = vld [vmem:[#allocation2 + $0x1] sm:$0x1] }
  0x41   : > { %608 = vmatpush.bf16.msra.mxu0 %v971_v23 }
  0x42   : > { %669 = vmatpush.bf16.msra.mxu1 %v979_v24 }
  0x45   : > { %609 = vmatpush.bf16.msra.mxu0 %v970_v25 }
  0x46   : > { %670 = vmatpush.bf16.msra.mxu1 %v978_v26 }
  0x49   : > { %610 = vmatpush.bf16.msra.mxu0 %v969_v27 }
  0x4a   : > { %671 = vmatpush.bf16.msra.mxu1 %v977_v28 }
  0x4d   : > { %611 = vmatpush.bf16.msra.mxu0 %v968_v29 }
  0x4e   : > { %672 = vmatpush.bf16.msra.mxu1 %v976_v30 }
  0x51   : > { %612 = vmatpush.bf16.msra.mxu0 %v967_v31 }
  0x52   : > { %673 = vmatpush.bf16.msra.mxu1 %v975_v32 }
  0x55   : > { %613 = vmatpush.bf16.msra.mxu0 %v966_v33 }
  0x56   : > { %674 = vmatpush.bf16.msra.mxu1 %v974_v34 }
  0x58   : > { %614 = vmatmul.bf16.vlgmr.msra.gmra.mxu0 %v524_v35 }
  0x59   : > { %675 = vmatmul.bf16.vlgmr.msra.gmra.mxu1 %v525_v36 }
  0xd5   : > { %v615_v39 = vpop.f32.mrf.mxu0 }
  0xd6   : > { %v676_v40 = vpop.f32.mrf.mxu1  ;;  %v680_v41 = vadd.f32 %v615_v39, %v522_v37 }
  0xd7   : > { %v681_v42 = vadd.f32 %v676_v40, %v523_v38 }
  0xd8   : > { %683 = vst.msk [vmem:[#allocation2] sm:$0x1] %vm682_vm1, %v680_v41 }
  0xd9   : > { %684 = vst.msk [vmem:[#allocation2 + $0x1] sm:$0x1] %vm682_vm1, %v681_v42 }
  0xda   : > { %688 = sbr.rel (%p957_p10) target bundleno = 492 (0x1ec), region = 123 }
  0xdd   : > { %v617_v43 = vpop.f32.mrf.mxu0 }
  0xde   : > { %v678_v44 = vpop.f32.mrf.mxu1 }
  0xdf   : > { %v693_v45 = vld [vmem:[%s1347_s2] sm:$0x3]  ;;  %v1145_v46 = vmov 0   ;;  %v716_v47 = vld [vmem:[%s1348_s3 + $0x18] sm:$0xff]  ;;  %v715_v48 = vld [vmem:[%s1348_s3 + $0x10] sm:$0xff]  ;;  %vm711_vm2 = vcmask 254976  }
  0xe0   : > { %1038 = vset.pattern.permute.xlu0 %v1145_v46  ;;  %740 = vmatpush.msra.mxu0 %v716_v47  ;;  %v714_v49 = vld [vmem:[%s1348_s3 + $0x8] sm:$0xff]  ;;  %v713_v50 = vld [vmem:[%s1348_s3] sm:$0xff]  ;;  %vm725_vm3 = vcmask 261120  }
  0xe1   : > { %696 = vperm.xlu0 %1038, %v693_v45   ;;  %v689_v52 = vld [vmem:[#allocation2] sm:$0x1]  ;;  %v690_v53 = vld [vmem:[#allocation2 + $0x1] sm:$0x1]  ;;  %v1039_v60 = vld [vmem:[%s1349_s4] ss:$0 sm:$0xff] }
  0xe2   : > { %741 = vmatpush.msra.mxu0 %v715_v48 }
  0xe4   : > { %742 = vmatpush.msra.mxu0 %v714_v49 }
  0xe6   : > { %743 = vmatpush.msra.mxu0 %v713_v50 }
 0x153   : > { %v697_v51 = vpop.permute.xlu0 %696 }
 0x154   : > { %v698_v54 = vperm.slane %v697_v51, 0  ;;  %v699_v55 = vperm.slane %v697_v51, 1 }
 0x156   : > { %v702_v56 = vmul.f32 %v698_v54, %v689_v52  ;;  %v703_v57 = vmul.f32 %v699_v55, %v690_v53 }
 0x158   : > { %706 = vst [vmem:[#allocation1] ss:$9 sm:$0xff] %v702_v56 }
 0x159   : > { %708 = vst [vmem:[#allocation1 + $0x1] ss:$9 sm:$0xff] %v703_v57 }
 0x160   : > { %v709_v58 = vld [vmem:[#allocation1] sm:$0xff] }
 0x161   : > { %712 = vst.msk [vmem:[#allocation5] sm:$0x3] %vm711_vm2, %v709_v58 }
 0x162   : > { %721 = vst [vmem:[#allocation1] ss:$9 sm:$0xff] %v702_v56 }
 0x163   : > { %723 = vst [vmem:[#allocation1 + $0x1] ss:$9 sm:$0xff] %v703_v57 }
 0x16a   : > { %v724_v59 = vld [vmem:[#allocation1] sm:$0xff] }
 0x16b   : > { %958 = vmatmul.msk.f32.vlgmr.msra.gmra.mxu0 %vm725_vm3, %v724_v59 }
 0x1e8   : > { %v745_v61 = vpop.f32.mrf.mxu0 }
 0x1e9   : > { %v746_v62 = vadd.f32 %v1039_v60, %v745_v61 }
 0x1eb   : > { %748 = vst [vmem:[#allocation7] sm:$0x3] %v746_v62 }
 0x1ec PF: > { %p1308_p11 = scmp.eq.s32.totalorder %s881_s26, 1  ;;  %s759_s30 = sshll.u32 %s1350_s5, 4  ;;  %s760_s30 = int_to_ptr.hbm [resolvable:$true] %s759_s30 }
 0x1ed   : > { %s1146_s8 = smov [#allocation5]   ;;  %s1147_s21 = smov [#allocation7]  }
 0x1ee   : > { %s757_s9 = sshll.u32 %s1146_s8, 4  ;;  %s771_s10 = sshll.u32 %s1147_s21, 4  ;;  %s758_s9 = int_to_ptr.vmem [resolvable:$true] %s757_s9  ;;  %s772_s10 = int_to_ptr.vmem [resolvable:$true] %s771_s10 }
 0x1ef   : > { %983 = dma.vmem_to_hbm [thread:$0]  (%p1308_p11), %s758_s9, 32, %s760_s30, [#allocation6]  }
 0x1f0   : > { %s773_s12 = sshll.u32 %s1351_s6, 4  ;;  %s774_s12 = int_to_ptr.hbm [resolvable:$true] %s773_s12 }
 0x1f1   : > { %985 = dma.vmem_to_hbm [thread:$0]  (%p1308_p11), %s772_s10, 32, %s774_s12, [#allocation8]  }
 0x1f2   : > { %1117 = dma.done.wait (%p1308_p11), [#allocation6], 32  }
 0x1f3   : > { %1119 = vsyncadd (%p1308_p11), [#allocation6], 4294967264 }
 0x1f4   : > { %1121 = dma.done.wait (%p1308_p11), [#allocation8], 32  }
 0x1f5   : > { %1123 = vsyncadd (%p1308_p11), [#allocation8], 4294967264 }
 0x1f6 PF: > { %s19_s25 = sadd.s32 1, %s1142_s25   ;;  %s1354_s21 = smov %s1130_s22 }
 0x1f7   : > { %p16_p12 = scmp.ge.s32.totalorder %s19_s25, 4   ;;  %s1355_s22 = smov %s1223_s7 }
 0x1f8   : > { %s1356_s23 = smov %s1138_s24  ;;  %s1357_s24 = smov %s1359_s27 }
 0x1f9   :  { %18 = sbr.rel (!%p16_p12) target bundleno = 4 (0x4), region = 178 }
 0x1fe   :  { %792 = vsyncpa [#allocation6], 1 }
 0x1ff   :  { %794 = vsyncpa [#allocation6 + $0x1], 1 }
 0x200   :  { %795 = vsyncpa [#allocation8], 1 }

</bundles_post_ra>
